<compile_context>
chip_gen: v5e
topology: v5e:2x2
jax: 0.10.0
libtpu: 0.0.40
codegen_flags: <defaults>
</compile_context>

<pallas_src>
import jax
import jax.numpy as jnp
import numpy as np
from jax.experimental import pallas as pl
from jax.experimental.pallas import tpu as pltpu


def _round_up(x, m):
    return (x + m - 1) // m * m


def make_pos_indices(size):
    """The pos_indices buffer from RelPosBias2d.__init__ (host-side, static)."""
    arange = np.arange(size)
    gy, gx = np.meshgrid(arange, arange, indexing="ij")
    pos = np.stack([gy, gx], axis=-1).reshape(-1, 2)            # (size^2, 2)
    rel = pos[:, None, :] - pos[None, :, :] + (size - 1)        # (s2, s2, 2)
    return (rel[..., 0] * (2 * size - 1) + rel[..., 1]).astype(np.int32)


def make_relpos_onehot(size, i, j):
    """Static (V, N_pad) bf16 one-hot gather matrix for a given (size, i, j).

    Column n selects the embedding row for flattened output position n.  The
    PyTorch forward's left zero-pad column and the lane padding beyond i*j are
    all-zero columns (sentinel -1 matches no embedding row).
    """
    V = (2 * size - 1) ** 2
    N = i * j
    N_pad = _round_up(N, 128)
    pos_indices = make_pos_indices(size)
    idx = pos_indices[:i, : j - 1]                              # (i, j-1)
    idx_full = np.concatenate(
        [np.full((i, 1), -1, np.int32), idx], axis=1)           # (i, j)
    idx_flat = np.full((N_pad,), -1, np.int32)
    idx_flat[:N] = idx_full.reshape(-1)
    onehot = (np.arange(V)[:, None] == idx_flat[None, :])       # (V, N_pad) of 0/1
    # 0/1 are exact in bf16; halves the constant's HBM->VMEM traffic.
    return jnp.asarray(onehot.astype(np.float32), dtype=jnp.bfloat16)


def _relpos_bias_kernel(w_ref, onehot_ref, out_ref):
    # w_ref:      (V, H_pad)       f32  embedding table (un-transposed, head-padded)
    # onehot_ref: (V, tile_n)      bf16 static gather one-hot tile
    # out_ref:    (H_pad, tile_n)  f32  sublane-full / lane-dense -> unmasked store
    onehot = onehot_ref[...].astype(jnp.float32)   # exact cast; keeps f32 matmul path
    out_ref[...] = jax.lax.dot_general(
        w_ref[...], onehot,
        dimension_numbers=(((0,), (0,)), ((), ())),  # contract V; MXU consumes LHS^T
        preferred_element_type=jnp.float32)


def _pick_tile_n(n_pad, max_tile=512):
    """Largest multiple of 128 dividing n_pad and <= max_tile.

    max_tile=512 keeps the double-buffered (V, tile_n) bf16 one-hot tile well
    inside the default scoped-VMEM budget even for large `size`, including
    v7x's smaller 64 MiB physical VMEM.
    """
    if n_pad <= max_tile:
        return n_pad
    t = (max_tile // 128) * 128
    while n_pad % t:
        t -= 128
    return t


def rel_pos_bias_2d(qk, pos_bias_weight, onehot):
    """Forward of RelPosBias2d. qk: (..., i, j). Returns (heads, i, j) f32 bias."""
    i, j = qk.shape[-2], qk.shape[-1]
    V, heads = pos_bias_weight.shape
    N = i * j
    N_pad = onehot.shape[1]
    assert onehot.shape[0] == V and N_pad == _round_up(N, 128), (
        "onehot constant does not match (size, i, j); rebuild with make_relpos_onehot")

    H_pad = _round_up(heads, 8)
    w = pos_bias_weight.astype(jnp.float32)
    if H_pad != heads:
        # Tiny zero-pad so the kernel's output tile is sublane-full and stored
        # unmasked.  For frozen / inference weights this pad (like the one-hot)
        # can be hoisted out of the per-call path entirely.
        w = jnp.pad(w, ((0, 0), (0, H_pad - heads)))

    tile_n = _pick_tile_n(N_pad)
    grid = (N_pad // tile_n,)

    out = pl.pallas_call(
        _relpos_bias_kernel,
        out_shape=jax.ShapeDtypeStruct((H_pad, N_pad), jnp.float32),
        grid=grid,
        in_specs=[
            pl.BlockSpec((V, H_pad), lambda n: (0, 0)),    # whole (tiny) table each tile
            pl.BlockSpec((V, tile_n), lambda n: (0, n)),   # one-hot lane tile
        ],
        out_specs=pl.BlockSpec((H_pad, tile_n), lambda n: (0, n)),
        compiler_params=pltpu.CompilerParams(
            # Independent lane tiles: shards across v7x's 2 TensorCores when the
            # grid is > 1; at small sizes the grid collapses to a single step.
            dimension_semantics=("parallel",)),
    )(w, onehot)

    # TODO(synk): for end-to-end wins, fuse this bias into the qk consumer
    # (qk + bias inside the attention kernel) instead of round-tripping the
    # standalone bias through HBM; the PyTorch module returns the bias alone,
    # so that contract is preserved here.
    return out[:heads, :N].reshape(heads, i, j)


if __name__ == "__main__":
    size = 4                     # spatial side -> i = size*size = 16
    heads = 4
    batch = 2
    i = size * size              # 16
    j = i + 1                    # 17 (extra leading column -> zero pad, as in the module)
    V = (2 * size - 1) ** 2      # 49

    key = jax.random.PRNGKey(0)
    k_emb, k_qk = jax.random.split(key)
    # nn.Embedding((2*size-1)**2, heads): weight ~ N(0, 1), deterministic here.
    pos_bias_weight = jax.random.normal(k_emb, (V, heads), dtype=jnp.float32)
    qk = jax.random.normal(k_qk, (batch, heads, i, j), dtype=jnp.float32)

    # Static precompute (the Pallas analogue of the module's __init__ buffers).
    onehot = make_relpos_onehot(size, i, j)          # (49, 384) bf16 constant

    fwd = jax.jit(rel_pos_bias_2d)
    bias = jax.block_until_ready(fwd(qk, pos_bias_weight, onehot))

    # Pure-JAX reference of the PyTorch forward (gather -> transpose -> pad).
    pos_indices = jnp.asarray(make_pos_indices(size))
    ref = pos_bias_weight[pos_indices[:i, : j - 1]]  # (i, j-1, h)
    ref = jnp.transpose(ref, (2, 0, 1))              # (h, i, j-1)
    ref = jnp.pad(ref, ((0, 0), (0, 0), (j - ref.shape[-1], 0)))
    np.testing.assert_allclose(np.asarray(bias), np.asarray(ref),
                               atol=1e-5, rtol=1e-5)

    print("KERNEL_OK")
</pallas_src>

<mosaic_0001>
module attributes {stable_mosaic.version = 11 : i64} {
  func.func @_relpos_bias_kernel(%arg0: i32, %arg1: memref<49x8xf32, #tpu.memory_space<vmem>>, %arg2: memref<49x384xbf16, #tpu.memory_space<vmem>>, %arg3: memref<8x384xf32, #tpu.memory_space<vmem>>) attributes {dimension_semantics = [#tpu.dimension_semantics<parallel>], iteration_bounds = array<i64: 1>, scalar_prefetch = 0 : i64, scratch_operands = 0 : i64, tpu.core_type = #tpu.core_type<tc>, window_params = [{pipeline_mode = #tpu.pipeline_mode<synchronous>, transform_indices = @transform_0, window_bounds = array<i64: 49, 8>}, {transform_indices = @transform_1, window_bounds = array<i64: 49, 384>}, {transform_indices = @transform_2, window_bounds = array<i64: 8, 384>}]} {
    %c0 = arith.constant 0 : index
    %c0_0 = arith.constant 0 : index
    %0 = vector.load %arg2[%c0, %c0_0] : memref<49x384xbf16, #tpu.memory_space<vmem>>, vector<49x384xbf16>
    %1 = arith.extf %0 : vector<49x384xbf16> to vector<49x384xf32>
    %c0_1 = arith.constant 0 : index
    %c0_2 = arith.constant 0 : index
    %2 = vector.load %arg1[%c0_1, %c0_2] : memref<49x8xf32, #tpu.memory_space<vmem>>, vector<49x8xf32>
    %cst = arith.constant dense<0.000000e+00> : vector<8x384xf32>
    %3 = tpu.matmul %2, %1, %cst {dimension_numbers = #tpu.dot_dimension_numbers<[0], [0], [1], [1], [0, 1, 1, 1], [], []>} : vector<49x8xf32>, vector<49x384xf32>, vector<8x384xf32> -> vector<8x384xf32>
    %c0_3 = arith.constant 0 : index
    %c0_4 = arith.constant 0 : index
    %4 = vector.load %arg3[%c0_3, %c0_4] : memref<8x384xf32, #tpu.memory_space<vmem>>, vector<8x384xf32>
    tpu.vector_store %arg3[%c0_3, %c0_4], %3 {strides = array<i32>} : memref<8x384xf32, #tpu.memory_space<vmem>>, vector<8x384xf32>,
    return
  }
  func.func @transform_0(%arg0: i32) -> (i32, i32) {
    %c0_i32 = arith.constant 0 : i32
    %c0_i32_0 = arith.constant 0 : i32
    %c0_i32_1 = arith.constant 0 : i32
    return %c0_i32, %c0_i32_0 : i32, i32
  }
  func.func @transform_1(%arg0: i32) -> (i32, i32) {
    %c0_i32 = arith.constant 0 : i32
    %c0_i32_0 = arith.constant 0 : i32
    return %c0_i32, %arg0 : i32, i32
  }
  func.func @transform_2(%arg0: i32) -> (i32, i32) {
    %c0_i32 = arith.constant 0 : i32
    %c0_i32_0 = arith.constant 0 : i32
    return %c0_i32, %arg0 : i32, i32
  }
}

</mosaic_0001>

<bundles_post_ra>
// kernel: rel_pos_bias_2d.1
= control target key start
LH: loop header
LB: loop body
LE: loop exit
PB: predicated region body
PF: predicated region fallthrough
CT: control target
= control target key end

     0   :  { %vm89_vm0 = vcmask 1040384   ;;  %vm85_vm1 = vcmask 400384   ;;  %s263_s0 = inlined_call_operand.vmem [shape: f32[49,8], index: 0, kind: input, shape index: {}]   ;;  %s264_s1 = inlined_call_operand.vmem [shape: bf16[49,384], index: 1, kind: input, shape index: {}]   ;;  %s265_s2 = inlined_call_operand.vmem [shape: f32[8,384], index: 2, kind: output, shape index: {}]  }
   0x1   :  { %v46_v0 = vld [vmem:[%s263_s0] sm:$0xff]  ;;  %v47_v1 = vld [vmem:[%s263_s0 + $0x8] sm:$0xff]  ;;  %v48_v2 = vld [vmem:[%s263_s0 + $0x10] sm:$0xff] }
   0x2   :  { %53 = vxpose.xlu0.b32.start [1/7] (short) (narrow) %v46_v0, 8  ;;  %v23_v3 = vld [vmem:[%s264_s1 + $0x48] sm:$0x11]  ;;  %v24_v4 = vld [vmem:[%s264_s1 + $0x50] sm:$0x1]  ;;  %v21_v8 = vld [vmem:[%s264_s1 + $0x3c] sm:$0xff] }
   0x3   :  { %v43_v5 = vunpack.c.l.bf16 %v23_v3  ;;  %v44_v6 = vunpack.c.h.bf16 %v23_v3  ;;  %v45_v7 = vunpack.c.l.bf16 %v24_v4  ;;  %v22_v9 = vld [vmem:[%s264_s1 + $0x44] sm:$0xf]  ;;  %v19_v10 = vld [vmem:[%s264_s1 + $0x30] sm:$0xff]  ;;  %v40_v11 = vunpack.c.l.bf16 %v21_v8  ;;  %v20_v14 = vld [vmem:[%s264_s1 + $0x38] sm:$0xf] }
   0x4   :  { %v41_v12 = vunpack.c.h.bf16 %v21_v8  ;;  %v42_v13 = vunpack.c.l.bf16 %v22_v9  ;;  %v17_v15 = vld [vmem:[%s264_s1 + $0x24] sm:$0xff]  ;;  %v37_v16 = vunpack.c.l.bf16 %v19_v10  ;;  %v38_v17 = vunpack.c.h.bf16 %v19_v10  ;;  %v18_v18 = vld [vmem:[%s264_s1 + $0x2c] sm:$0xf]  ;;  %v15_v20 = vld [vmem:[%s264_s1 + $0x18] sm:$0xff] }
   0x5   :  { %166 = vmatpush.msk.msra.mxu0 %vm89_vm0, %v43_v5  ;;  %168 = vmatpush.msk.msra.mxu1 %vm89_vm0, %v44_v6  ;;  %v39_v19 = vunpack.c.l.bf16 %v20_v14  ;;  %v49_v21 = vld [vmem:[%s263_s0 + $0x18] sm:$0xff]  ;;  %v34_v22 = vunpack.c.l.bf16 %v17_v15  ;;  %v35_v23 = vunpack.c.h.bf16 %v17_v15  ;;  %v16_v24 = vld [vmem:[%s264_s1 + $0x20] sm:$0xf]  ;;  %v36_v25 = vunpack.c.l.bf16 %v18_v18  ;;  %v13_v26 = vld [vmem:[%s264_s1 + $0xc] sm:$0xff] }
   0x6   :  { %170 = vmatpush.msk.msra.mxu2 %vm89_vm0, %v45_v7  ;;  %v31_v27 = vunpack.c.l.bf16 %v15_v20  ;;  %v32_v28 = vunpack.c.h.bf16 %v15_v20  ;;  %v14_v29 = vld [vmem:[%s264_s1 + $0x14] sm:$0xf]  ;;  %v33_v30 = vunpack.c.l.bf16 %v16_v24  ;;  %v11_v31 = vld [vmem:[%s264_s1] sm:$0xff]  ;;  %v28_v32 = vunpack.c.l.bf16 %v13_v26  ;;  %v12_v34 = vld [vmem:[%s264_s1 + $0x8] sm:$0xf] }
   0x7   :  { %109 = vmatpush.msra.mxu0 %v40_v11  ;;  %129 = vmatpush.msra.mxu1 %v41_v12  ;;  %v29_v33 = vunpack.c.h.bf16 %v13_v26  ;;  %v30_v35 = vunpack.c.l.bf16 %v14_v29  ;;  %v25_v36 = vunpack.c.l.bf16 %v11_v31  ;;  %v26_v37 = vunpack.c.h.bf16 %v11_v31  ;;  %v50_v39 = vld [vmem:[%s263_s0 + $0x20] sm:$0xff]  ;;  %v51_v40 = vld [vmem:[%s263_s0 + $0x28] sm:$0xff]  ;;  %v52_v41 = vld [vmem:[%s263_s0 + $0x30] sm:$0x1] }
   0x8   :  { %149 = vmatpush.msra.mxu2 %v42_v13  ;;  %v27_v38 = vunpack.c.l.bf16 %v12_v34 }
   0x9   :  { %110 = vmatpush.msra.mxu0 %v37_v16  ;;  %130 = vmatpush.msra.mxu1 %v38_v17 }
   0xa   :  { %54 = vxpose.xlu0.b32.cont [2/7] (short) (narrow) %v47_v1, 8  ;;  %150 = vmatpush.msra.mxu2 %v39_v19 }
   0xb   :  { %111 = vmatpush.msra.mxu0 %v34_v22  ;;  %131 = vmatpush.msra.mxu1 %v35_v23 }
   0xc   :  { %151 = vmatpush.msra.mxu2 %v36_v25 }
   0xd   :  { %112 = vmatpush.msra.mxu0 %v31_v27  ;;  %132 = vmatpush.msra.mxu1 %v32_v28 }
   0xe   :  { %152 = vmatpush.msra.mxu2 %v33_v30 }
   0xf   :  { %113 = vmatpush.msra.mxu0 %v28_v32  ;;  %133 = vmatpush.msra.mxu1 %v29_v33 }
  0x10   :  { %153 = vmatpush.msra.mxu2 %v30_v35 }
  0x11   :  { %114 = vmatpush.msra.mxu0 %v25_v36  ;;  %134 = vmatpush.msra.mxu1 %v26_v37 }
  0x12   :  { %55 = vxpose.xlu0.b32.cont [3/7] (short) (narrow) %v48_v2, 8  ;;  %154 = vmatpush.msra.mxu2 %v27_v38 }
  0x1a   :  { %56 = vxpose.xlu0.b32.cont [4/7] (short) (narrow) %v49_v21, 8 }
  0x22   :  { %57 = vxpose.xlu0.b32.cont [5/7] (short) (narrow) %v50_v39, 8 }
  0x2a   :  { %58 = vxpose.xlu0.b32.cont [6/7] (short) (narrow) %v51_v40, 8 }
  0x32   :  { %59 = vxpose.xlu0.b32.end [7/7] (short) (narrow) %v52_v41, 8 }
  0xa6   :  { %v69_v42 = vpop.trf.xlu0 }
  0xa7   :  { %167 = vmatmul.msk.f32.vlgmr.msra.gmra.mxu0 %vm85_vm1, %v69_v42  ;;  %169 = vmatmul.msk.f32.vlgmr.msra.gmra.mxu1 %vm85_vm1, %v69_v42 }
  0xa8   :  { %171 = vmatmul.msk.f32.vlgmr.msra.gmra.mxu2 %vm85_vm1, %v69_v42 }
 0x124   :  { %v116_v43 = vpop.f32.mrf.mxu0  ;;  %v136_v44 = vpop.f32.mrf.mxu1 }
 0x125   :  { %159 = vst [vmem:[%s265_s2] sm:$0xff] %v116_v43 }
 0x126   :  { %160 = vst [vmem:[%s265_s2 + $0x8] sm:$0xff] %v136_v44 }
 0x12b   :  { %v156_v45 = vpop.f32.mrf.mxu2 }
 0x12c   :  { %161 = vst [vmem:[%s265_s2 + $0x10] sm:$0xff] %v156_v45 }

</bundles_post_ra>
